<compile_context>
chip_gen: v6e
topology: v6e:2x2x1
jax: 0.10.0
libtpu: 0.0.40
codegen_flags: <defaults>
</compile_context>

<pallas_src>
import functools

import jax
import jax.numpy as jnp
from jax.experimental import pallas as pl
from jax.experimental.pallas import tpu as pltpu

_LANE = 128
_SUBLANE = 8
# Finite stand-in for -inf used for padded vocab columns and the initial
# running maxima, so the online-softmax rescales never evaluate (-inf)-(-inf).
_NEG_CAP = -1.0e30


def _kd_kernel(logits_ref, teacher_ref, labels_ref, out_ref,
               s_m, s_l, t_m, t_l, acc1, acc2, *,
               ignore_index, n_rows, vocab, row_tile, v_chunk):
    i = pl.program_id(0)            # row-tile index       ("parallel")
    k = pl.program_id(1)            # vocab-chunk index    ("arbitrary", innermost)
    nk = pl.num_programs(1)

    @pl.when(k == 0)
    def _init():
        neg = jnp.full((row_tile, 1), _NEG_CAP, dtype=jnp.float32)
        zero = jnp.zeros((row_tile, 1), dtype=jnp.float32)
        s_m[...] = neg
        t_m[...] = neg
        s_l[...] = zero
        t_l[...] = zero
        acc1[...] = zero
        acc2[...] = zero

    raw_logits = logits_ref[...]
    # isinf mask on the native-dtype load (keeps the f32 upcasts short-lived).
    fin = jnp.logical_not(jnp.isinf(raw_logits))
    logits = raw_logits.astype(jnp.float32)               # (TN, VC)
    teacher = teacher_ref[...].astype(jnp.float32)        # (TN, VC)

    if vocab % v_chunk != 0:
        # Ragged last chunk: neutralize padded columns with a large negative
        # *finite* value (exp underflows to 0, no NaNs) and drop them from the
        # masked accumulators.
        col = (jax.lax.broadcasted_iota(jnp.int32, (row_tile, v_chunk), 1)
               + k * v_chunk)
        col_ok = col < vocab
        logits = jnp.where(col_ok, logits, _NEG_CAP)
        teacher = jnp.where(col_ok, teacher, _NEG_CAP)
        fin = jnp.logical_and(fin, col_ok)

    # ---- teacher: online (unnormalized) softmax; the normalizer t_l is applied
    #      at the end as a per-row scalar divide — probabilities are never
    #      materialized. ----
    # TODO(synk): if profiling shows the EUP slot saturated on v6e/v7x, compute
    # this exp in bf16 (f32 accumulation) for ~2x EUP rate (keep f32 on v5e).
    t_m_old = t_m[...]
    t_m_new = jnp.maximum(t_m_old, jnp.max(teacher, axis=-1, keepdims=True))
    t_corr = jnp.exp(t_m_old - t_m_new)                    # (TN, 1)
    t_exp = jnp.exp(teacher - t_m_new)                     # (TN, VC)

    # ---- student: online log-sum-exp ----
    s_m_old = s_m[...]
    s_m_new = jnp.maximum(s_m_old, jnp.max(logits, axis=-1, keepdims=True))
    s_corr = jnp.exp(s_m_old - s_m_new)                    # (TN, 1)
    s_shift = logits - s_m_new                             # (TN, VC)

    s_l[...] = s_corr * s_l[...] + jnp.sum(jnp.exp(s_shift), axis=-1,
                                           keepdims=True)
    t_l[...] = t_corr * t_l[...] + jnp.sum(t_exp, axis=-1, keepdims=True)

    # masked sum(t_probs * logprobs), decomposed so no (TN, V) logprobs / prod
    # temporaries exist:
    #   sum_fin(t_exp * logprobs) = sum_fin(t_exp * s_shift) - lse * sum_fin(t_exp)
    zero_f = jnp.float32(0.0)
    c1 = jnp.sum(jnp.where(fin, t_exp * s_shift, zero_f), axis=-1,
                 keepdims=True)
    c2 = jnp.sum(jnp.where(fin, t_exp, zero_f), axis=-1, keepdims=True)

    # Rescale running accumulators to the new (s_m, t_m) reference points.
    # dm is finite thanks to the _NEG_CAP init (no (-inf)-(-inf)).
    dm = s_m_old - s_m_new
    acc1[...] = t_corr * (acc1[...] + dm * acc2[...]) + c1
    acc2[...] = t_corr * acc2[...] + c2
    s_m[...] = s_m_new
    t_m[...] = t_m_new

    @pl.when(k == nk - 1)
    def _finalize():
        lse = jnp.log(s_l[...])                            # (TN, 1)
        x = (acc1[...] - lse * acc2[...]) / t_l[...]       # (TN, 1)

        # Token mask (labels != ignore_index) AND row validity (cdiv padding).
        row = (jax.lax.broadcasted_iota(jnp.int32, (row_tile, 1), 0)
               + i * row_tile)
        valid = jnp.logical_and(labels_ref[...] != ignore_index, row < n_rows)

        # where-select (not multiply) so NaN garbage in padded rows is dropped.
        num_s = jnp.sum(jnp.where(valid, x, zero_f))
        den_s = jnp.sum(valid.astype(jnp.float32))

        # Lane-dense per-row-block partials: lane 0 = numerator,
        # lane 1 = token count.  Final reduction happens in JAX.
        lane = jax.lax.broadcasted_iota(jnp.int32, (1, 1, _LANE), 2)
        out_ref[...] = jnp.where(lane == 0, num_s,
                                 jnp.where(lane == 1, den_s, zero_f))


def _vmem_capacity_bytes():
    try:
        cap = getattr(pltpu.get_tpu_info(), "vmem_capacity_bytes", None)
        if cap:
            return int(cap)
    except Exception:
        pass
    # Fallback: derive from device_kind so v5e/v6e (128 MiB) are not sized as
    # if they only had v7x's 64 MiB per-core VMEM.
    try:
        kind = jax.devices()[0].device_kind.lower()
    except Exception:
        kind = ""
    if "v7" in kind:
        return 64 * 1024 * 1024
    if any(t in kind for t in ("v6", "trillium", "v5", "v4")):
        return 128 * 1024 * 1024
    return 64 * 1024 * 1024   # unknown chip: be conservative


def _pick_tiles(n_rows, vocab, in_itemsize, budget_bytes):
    """Choose (row_tile, vocab_chunk) so the steady-state VMEM footprint fits
    budget_bytes.

    Accounting per (row, vocab-column) element in flight:
      * 2 inputs x 2 pipeline buffers in native dtype     -> 4 * itemsize
      * ~6 live f32 (rows, chunk) temporaries (f32 upcasts of logits/teacher,
        t_exp, s_shift, exp(s_shift), masked product)      -> 24 bytes
    """
    bytes_per_elem = 2 * 2 * in_itemsize + 6 * 4

    row_cap = max(_SUBLANE, ((n_rows + _SUBLANE - 1) // _SUBLANE) * _SUBLANE)
    row_cap = min(row_cap, 1024)

    # Fast path: whole vocabulary per tile (single reduction step per row
    # block) whenever it still allows a reasonably tall row tile.
    rows_full_v = (budget_bytes // (bytes_per_elem * vocab)) // _SUBLANE * _SUBLANE
    if rows_full_v >= min(row_cap, 64):
        return min(rows_full_v, row_cap), vocab

    # Vocabulary too wide for the VMEM budget (e.g. 128k-vocab heads on v7x's
    # 64 MiB): chunk it along a second "arbitrary" grid axis (online softmax).
    # Chunk width must be a multiple of 128 lanes.
    row_tile = min(row_cap, 256)
    chunk = (budget_bytes // (bytes_per_elem * row_tile)) // _LANE * _LANE
    while chunk < _LANE and row_tile > _SUBLANE:
        row_tile = max(_SUBLANE, (row_tile // 2) // _SUBLANE * _SUBLANE)
        chunk = (budget_bytes // (bytes_per_elem * row_tile)) // _LANE * _LANE
    chunk = max(_LANE, min(chunk, vocab))  # the (8,128) floor tile always fits
    return row_tile, chunk


def kd_loss(logits, teacher_logits, labels, *, ignore_index=-100,
            row_tile=None, vocab_chunk=None, downcast_to_bf16=False):
    """logits / teacher_logits: (..., V) float (streamed in native dtype);
    labels: (...) int.  Returns the scalar float32 KD loss."""
    V = logits.shape[-1]
    N = 1
    for d in logits.shape[:-1]:
        N *= d

    if downcast_to_bf16 and logits.dtype == jnp.float32:
        # Optional HBM-bandwidth saving (mainly v5e, ~2x fewer input bytes);
        # measure the accuracy impact before enabling in training.
        logits = logits.astype(jnp.bfloat16)
        teacher_logits = teacher_logits.astype(jnp.bfloat16)

    logits2 = logits.reshape(N, V)
    teacher2 = teacher_logits.reshape(N, V)
    labels2 = labels.reshape(N, 1).astype(jnp.int32)

    vmem_cap = _vmem_capacity_bytes()
    sizing_budget = int(vmem_cap * 0.5)   # headroom: labels/output blocks,
                                          # per-row scratch, Mosaic internals
    vmem_limit = int(vmem_cap * 0.8)      # conservative even on v7x (64 MiB)

    itemsize = jnp.dtype(logits2.dtype).itemsize
    auto_rows, auto_chunk = _pick_tiles(N, V, itemsize, sizing_budget)
    if row_tile is None:
        row_tile = auto_rows
    if vocab_chunk is None:
        vocab_chunk = auto_chunk
    assert row_tile % _SUBLANE == 0 or row_tile == N
    assert vocab_chunk == V or vocab_chunk % _LANE == 0

    grid = (pl.cdiv(N, row_tile), pl.cdiv(V, vocab_chunk))

    kernel = functools.partial(
        _kd_kernel, ignore_index=ignore_index, n_rows=N, vocab=V,
        row_tile=row_tile, v_chunk=vocab_chunk)

    partials = pl.pallas_call(
        kernel,
        out_shape=jax.ShapeDtypeStruct((grid[0], 1, _LANE), jnp.float32),
        grid_spec=pltpu.PrefetchScalarGridSpec(
            num_scalar_prefetch=0,
            grid=grid,
            in_specs=[
                pl.BlockSpec((row_tile, vocab_chunk), lambda i, k: (i, k)),
                pl.BlockSpec((row_tile, vocab_chunk), lambda i, k: (i, k)),
                pl.BlockSpec((row_tile, 1), lambda i, k: (i, 0)),
            ],
            out_specs=pl.BlockSpec((1, 1, _LANE), lambda i, k: (i, 0, 0)),
            scratch_shapes=[pltpu.VMEM((row_tile, 1), jnp.float32)
                            for _ in range(6)],
        ),
        compiler_params=pltpu.CompilerParams(
            dimension_semantics=("parallel", "arbitrary"),
            vmem_limit_bytes=vmem_limit),
    )(logits2, teacher2, labels2)

    partials = partials.reshape(grid[0], _LANE)
    num = jnp.sum(partials[:, 0])
    den = jnp.sum(partials[:, 1])
    # NOTE: den == 0 (all labels ignored) yields NaN/Inf, matching the
    # PyTorch reference.
    return -(num / den)


def kd_loss_ref(logits, teacher_logits, labels, ignore_index=-100):
    """Pure-JAX reference mirroring the PyTorch forward."""
    teacher_probs = jax.nn.softmax(teacher_logits.astype(jnp.float32), axis=-1)
    inf_mask = jnp.isinf(logits.astype(jnp.float32))
    logprobs = jax.nn.log_softmax(logits.astype(jnp.float32), axis=-1)
    prod = jnp.where(inf_mask, 0.0, teacher_probs * logprobs)
    x = jnp.sum(prod, axis=-1).reshape(-1)
    mask = (labels != ignore_index).astype(jnp.float32).reshape(-1)
    return -jnp.sum(x * mask) / jnp.sum(mask)


if __name__ == "__main__":
    ignore_index = -100

    # ---- Test 1: small shapes, single full-vocab chunk (fast path). ----
    key = jax.random.PRNGKey(0)
    k1, k2, k3 = jax.random.split(key, 3)
    B, S, V = 2, 8, 256
    logits = jax.random.normal(k1, (B, S, V), dtype=jnp.float32)
    teacher_logits = jax.random.normal(k2, (B, S, V), dtype=jnp.float32)
    labels = jax.random.randint(k3, (B, S), 0, V).astype(jnp.int32)
    labels = labels.at[0, 0].set(ignore_index)
    labels = labels.at[1, 3].set(ignore_index)

    loss = kd_loss(logits, teacher_logits, labels, ignore_index=ignore_index)
    loss = jax.block_until_ready(loss)
    ref = kd_loss_ref(logits, teacher_logits, labels, ignore_index=ignore_index)
    assert jnp.allclose(loss, ref, rtol=1e-4, atol=1e-5), (loss, ref)

    # ---- Test 2: force the chunked-vocab (online softmax) path, with row
    #      padding (N=14, row_tile=8) and a ragged last vocab chunk
    #      (V=384, chunk=256). ----
    k4, k5, k6 = jax.random.split(jax.random.PRNGKey(1), 3)
    B2, S2, V2 = 2, 7, 384
    logits2 = jax.random.normal(k4, (B2, S2, V2), dtype=jnp.float32)
    teacher2 = jax.random.normal(k5, (B2, S2, V2), dtype=jnp.float32)
    labels2 = jax.random.randint(k6, (B2, S2), 0, V2).astype(jnp.int32)
    labels2 = labels2.at[0, 2].set(ignore_index)

    loss2 = kd_loss(logits2, teacher2, labels2, ignore_index=ignore_index,
                    row_tile=8, vocab_chunk=256)
    loss2 = jax.block_until_ready(loss2)
    ref2 = kd_loss_ref(logits2, teacher2, labels2, ignore_index=ignore_index)
    assert jnp.allclose(loss2, ref2, rtol=1e-4, atol=1e-5), (loss2, ref2)

    print("KERNEL_OK")
</pallas_src>

<mosaic_0001>
module attributes {stable_mosaic.version = 11 : i64} {
  func.func @_kd_kernel(%arg0: i32, %arg1: i32, %arg2: memref<16x256xf32, #tpu.memory_space<vmem>>, %arg3: memref<16x256xf32, #tpu.memory_space<vmem>>, %arg4: memref<16x1xi32, #tpu.memory_space<vmem>>, %arg5: memref<1x1x128xf32, #tpu.memory_space<vmem>>, %arg6: memref<16x1xf32, #tpu.memory_space<vmem>>, %arg7: memref<16x1xf32, #tpu.memory_space<vmem>>, %arg8: memref<16x1xf32, #tpu.memory_space<vmem>>, %arg9: memref<16x1xf32, #tpu.memory_space<vmem>>, %arg10: memref<16x1xf32, #tpu.memory_space<vmem>>, %arg11: memref<16x1xf32, #tpu.memory_space<vmem>>) attributes {dimension_semantics = [#tpu.dimension_semantics<parallel>, #tpu.dimension_semantics<arbitrary>], iteration_bounds = array<i64: 1, 1>, scalar_prefetch = 0 : i64, scratch_operands = 6 : i64, tpu.core_type = #tpu.core_type<tc>, window_params = [{transform_indices = @transform_0, window_bounds = array<i64: 16, 256>}, {transform_indices = @transform_1, window_bounds = array<i64: 16, 256>}, {transform_indices = @transform_2, window_bounds = array<i64: 16, 1>}, {transform_indices = @transform_3, window_bounds = array<i64: 1, 1, 128>}]} {
    %c0_i32 = arith.constant 0 : i32
    %0 = arith.cmpi eq, %arg1, %c0_i32 : i32
    %1 = arith.extui %0 : i1 to i32
    %c0_i32_0 = arith.constant 0 : i32
    %2 = arith.cmpi ne, %1, %c0_i32_0 : i32
    scf.if %2 {
      %cst_42 = arith.constant -1.000000e+30 : f32
      %65 = vector.broadcast %cst_42 : f32 to vector<16x1xf32>
      %cst_43 = arith.constant 0.000000e+00 : f32
      %66 = vector.broadcast %cst_43 : f32 to vector<16x1xf32>
      %c0_44 = arith.constant 0 : index
      %c0_45 = arith.constant 0 : index
      %67 = vector.load %arg6[%c0_44, %c0_45] : memref<16x1xf32, #tpu.memory_space<vmem>>, vector<16x1xf32>
      tpu.vector_store %arg6[%c0_44, %c0_45], %65 {strides = array<i32>} : memref<16x1xf32, #tpu.memory_space<vmem>>, vector<16x1xf32>,
      %c0_46 = arith.constant 0 : index
      %c0_47 = arith.constant 0 : index
      %68 = vector.load %arg8[%c0_46, %c0_47] : memref<16x1xf32, #tpu.memory_space<vmem>>, vector<16x1xf32>
      tpu.vector_store %arg8[%c0_46, %c0_47], %65 {strides = array<i32>} : memref<16x1xf32, #tpu.memory_space<vmem>>, vector<16x1xf32>,
      %c0_48 = arith.constant 0 : index
      %c0_49 = arith.constant 0 : index
      %69 = vector.load %arg7[%c0_48, %c0_49] : memref<16x1xf32, #tpu.memory_space<vmem>>, vector<16x1xf32>
      tpu.vector_store %arg7[%c0_48, %c0_49], %66 {strides = array<i32>} : memref<16x1xf32, #tpu.memory_space<vmem>>, vector<16x1xf32>,
      %c0_50 = arith.constant 0 : index
      %c0_51 = arith.constant 0 : index
      %70 = vector.load %arg9[%c0_50, %c0_51] : memref<16x1xf32, #tpu.memory_space<vmem>>, vector<16x1xf32>
      tpu.vector_store %arg9[%c0_50, %c0_51], %66 {strides = array<i32>} : memref<16x1xf32, #tpu.memory_space<vmem>>, vector<16x1xf32>,
      %c0_52 = arith.constant 0 : index
      %c0_53 = arith.constant 0 : index
      %71 = vector.load %arg10[%c0_52, %c0_53] : memref<16x1xf32, #tpu.memory_space<vmem>>, vector<16x1xf32>
      tpu.vector_store %arg10[%c0_52, %c0_53], %66 {strides = array<i32>} : memref<16x1xf32, #tpu.memory_space<vmem>>, vector<16x1xf32>,
      %c0_54 = arith.constant 0 : index
      %c0_55 = arith.constant 0 : index
      %72 = vector.load %arg11[%c0_54, %c0_55] : memref<16x1xf32, #tpu.memory_space<vmem>>, vector<16x1xf32>
      tpu.vector_store %arg11[%c0_54, %c0_55], %66 {strides = array<i32>} : memref<16x1xf32, #tpu.memory_space<vmem>>, vector<16x1xf32>,
    } else {
    }
    %c0 = arith.constant 0 : index
    %c0_1 = arith.constant 0 : index
    %3 = vector.load %arg2[%c0, %c0_1] : memref<16x256xf32, #tpu.memory_space<vmem>>, vector<16x256xf32>
    %4 = math.absf %3 : vector<16x256xf32>
    %cst = arith.constant 0x7F800000 : f32
    %5 = vector.broadcast %cst : f32 to vector<16x256xf32>
    %6 = arith.cmpf oeq, %4, %5 : vector<16x256xf32>
    %cst_2 = arith.constant dense<true> : vector<16x256xi1>
    %7 = arith.xori %6, %cst_2 : vector<16x256xi1>
    %c0_3 = arith.constant 0 : index
    %c0_4 = arith.constant 0 : index
    %8 = vector.load %arg3[%c0_3, %c0_4] : memref<16x256xf32, #tpu.memory_space<vmem>>, vector<16x256xf32>
    %c0_5 = arith.constant 0 : index
    %c0_6 = arith.constant 0 : index
    %9 = vector.load %arg8[%c0_5, %c0_6] : memref<16x1xf32, #tpu.memory_space<vmem>>, vector<16x1xf32>
    %cst_7 = arith.constant dense<0xFF800000> : vector<16xf32>
    %10 = vector.multi_reduction <maximumf>, %8, %cst_7 [1] : vector<16x256xf32> to vector<16xf32>
    %11 = vector.shape_cast %10 : vector<16xf32> to vector<16x1xf32>
    %12 = arith.maximumf %9, %11 : vector<16x1xf32>
    %13 = arith.subf %9, %12 : vector<16x1xf32>
    %14 = math.exp %13 : vector<16x1xf32>
    %15 = vector.broadcast %12 : vector<16x1xf32> to vector<16x256xf32>
    %16 = arith.subf %8, %15 : vector<16x256xf32>
    %17 = math.exp %16 : vector<16x256xf32>
    %c0_8 = arith.constant 0 : index
    %c0_9 = arith.constant 0 : index
    %18 = vector.load %arg6[%c0_8, %c0_9] : memref<16x1xf32, #tpu.memory_space<vmem>>, vector<16x1xf32>
    %cst_10 = arith.constant dense<0xFF800000> : vector<16xf32>
    %19 = vector.multi_reduction <maximumf>, %3, %cst_10 [1] : vector<16x256xf32> to vector<16xf32>
    %20 = vector.shape_cast %19 : vector<16xf32> to vector<16x1xf32>
    %21 = arith.maximumf %18, %20 : vector<16x1xf32>
    %22 = arith.subf %18, %21 : vector<16x1xf32>
    %23 = math.exp %22 : vector<16x1xf32>
    %24 = vector.broadcast %21 : vector<16x1xf32> to vector<16x256xf32>
    %25 = arith.subf %3, %24 : vector<16x256xf32>
    %c0_11 = arith.constant 0 : index
    %c0_12 = arith.constant 0 : index
    %26 = vector.load %arg7[%c0_11, %c0_12] : memref<16x1xf32, #tpu.memory_space<vmem>>, vector<16x1xf32>
    %27 = arith.mulf %23, %26 : vector<16x1xf32>
    %28 = math.exp %25 : vector<16x256xf32>
    %cst_13 = arith.constant dense<0.000000e+00> : vector<16xf32>
    %29 = vector.multi_reduction <add>, %28, %cst_13 [1] : vector<16x256xf32> to vector<16xf32>
    %30 = vector.shape_cast %29 : vector<16xf32> to vector<16x1xf32>
    %31 = arith.addf %27, %30 : vector<16x1xf32>
    %c0_14 = arith.constant 0 : index
    %c0_15 = arith.constant 0 : index
    %32 = vector.load %arg7[%c0_14, %c0_15] : memref<16x1xf32, #tpu.memory_space<vmem>>, vector<16x1xf32>
    tpu.vector_store %arg7[%c0_14, %c0_15], %31 {strides = array<i32>} : memref<16x1xf32, #tpu.memory_space<vmem>>, vector<16x1xf32>,
    %c0_16 = arith.constant 0 : index
    %c0_17 = arith.constant 0 : index
    %33 = vector.load %arg9[%c0_16, %c0_17] : memref<16x1xf32, #tpu.memory_space<vmem>>, vector<16x1xf32>
    %34 = arith.mulf %14, %33 : vector<16x1xf32>
    %cst_18 = arith.constant dense<0.000000e+00> : vector<16xf32>
    %35 = vector.multi_reduction <add>, %17, %cst_18 [1] : vector<16x256xf32> to vector<16xf32>
    %36 = vector.shape_cast %35 : vector<16xf32> to vector<16x1xf32>
    %37 = arith.addf %34, %36 : vector<16x1xf32>
    %c0_19 = arith.constant 0 : index
    %c0_20 = arith.constant 0 : index
    %38 = vector.load %arg9[%c0_19, %c0_20] : memref<16x1xf32, #tpu.memory_space<vmem>>, vector<16x1xf32>
    tpu.vector_store %arg9[%c0_19, %c0_20], %37 {strides = array<i32>} : memref<16x1xf32, #tpu.memory_space<vmem>>, vector<16x1xf32>,
    %39 = arith.mulf %17, %25 : vector<16x256xf32>
    %cst_21 = arith.constant 0.000000e+00 : f32
    %40 = vector.broadcast %cst_21 : f32 to vector<16x256xf32>
    %41 = arith.select %7, %39, %40 : vector<16x256xi1>, vector<16x256xf32>
    %cst_22 = arith.constant dense<0.000000e+00> : vector<16xf32>
    %42 = vector.multi_reduction <add>, %41, %cst_22 [1] : vector<16x256xf32> to vector<16xf32>
    %43 = vector.shape_cast %42 : vector<16xf32> to vector<16x1xf32>
    %cst_23 = arith.constant 0.000000e+00 : f32
    %44 = vector.broadcast %cst_23 : f32 to vector<16x256xf32>
    %45 = arith.select %7, %17, %44 : vector<16x256xi1>, vector<16x256xf32>
    %cst_24 = arith.constant dense<0.000000e+00> : vector<16xf32>
    %46 = vector.multi_reduction <add>, %45, %cst_24 [1] : vector<16x256xf32> to vector<16xf32>
    %47 = vector.shape_cast %46 : vector<16xf32> to vector<16x1xf32>
    %48 = arith.subf %18, %21 : vector<16x1xf32>
    %c0_25 = arith.constant 0 : index
    %c0_26 = arith.constant 0 : index
    %49 = vector.load %arg10[%c0_25, %c0_26] : memref<16x1xf32, #tpu.memory_space<vmem>>, vector<16x1xf32>
    %c0_27 = arith.constant 0 : index
    %c0_28 = arith.constant 0 : index
    %50 = vector.load %arg11[%c0_27, %c0_28] : memref<16x1xf32, #tpu.memory_space<vmem>>, vector<16x1xf32>
    %51 = arith.mulf %48, %50 : vector<16x1xf32>
    %52 = arith.addf %49, %51 : vector<16x1xf32>
    %53 = arith.mulf %14, %52 : vector<16x1xf32>
    %54 = arith.addf %53, %43 : vector<16x1xf32>
    %c0_29 = arith.constant 0 : index
    %c0_30 = arith.constant 0 : index
    %55 = vector.load %arg10[%c0_29, %c0_30] : memref<16x1xf32, #tpu.memory_space<vmem>>, vector<16x1xf32>
    tpu.vector_store %arg10[%c0_29, %c0_30], %54 {strides = array<i32>} : memref<16x1xf32, #tpu.memory_space<vmem>>, vector<16x1xf32>,
    %c0_31 = arith.constant 0 : index
    %c0_32 = arith.constant 0 : index
    %56 = vector.load %arg11[%c0_31, %c0_32] : memref<16x1xf32, #tpu.memory_space<vmem>>, vector<16x1xf32>
    %57 = arith.mulf %14, %56 : vector<16x1xf32>
    %58 = arith.addf %57, %47 : vector<16x1xf32>
    %c0_33 = arith.constant 0 : index
    %c0_34 = arith.constant 0 : index
    %59 = vector.load %arg11[%c0_33, %c0_34] : memref<16x1xf32, #tpu.memory_space<vmem>>, vector<16x1xf32>
    tpu.vector_store %arg11[%c0_33, %c0_34], %58 {strides = array<i32>} : memref<16x1xf32, #tpu.memory_space<vmem>>, vector<16x1xf32>,
    %c0_35 = arith.constant 0 : index
    %c0_36 = arith.constant 0 : index
    %60 = vector.load %arg6[%c0_35, %c0_36] : memref<16x1xf32, #tpu.memory_space<vmem>>, vector<16x1xf32>
    tpu.vector_store %arg6[%c0_35, %c0_36], %21 {strides = array<i32>} : memref<16x1xf32, #tpu.memory_space<vmem>>, vector<16x1xf32>,
    %c0_37 = arith.constant 0 : index
    %c0_38 = arith.constant 0 : index
    %61 = vector.load %arg8[%c0_37, %c0_38] : memref<16x1xf32, #tpu.memory_space<vmem>>, vector<16x1xf32>
    tpu.vector_store %arg8[%c0_37, %c0_38], %12 {strides = array<i32>} : memref<16x1xf32, #tpu.memory_space<vmem>>, vector<16x1xf32>,
    %c0_i32_39 = arith.constant 0 : i32
    %62 = arith.cmpi eq, %arg1, %c0_i32_39 : i32
    %63 = arith.extui %62 : i1 to i32
    %cst_40 = arith.constant 0.000000e+00 : f32
    %c0_i32_41 = arith.constant 0 : i32
    %64 = arith.cmpi ne, %63, %c0_i32_41 : i32
    scf.if %64 {
      %c0_42 = arith.constant 0 : index
      %c0_43 = arith.constant 0 : index
      %65 = vector.load %arg7[%c0_42, %c0_43] : memref<16x1xf32, #tpu.memory_space<vmem>>, vector<16x1xf32>
      %66 = math.log %65 : vector<16x1xf32>
      %c0_44 = arith.constant 0 : index
      %c0_45 = arith.constant 0 : index
      %67 = vector.load %arg10[%c0_44, %c0_45] : memref<16x1xf32, #tpu.memory_space<vmem>>, vector<16x1xf32>
      %c0_46 = arith.constant 0 : index
      %c0_47 = arith.constant 0 : index
      %68 = vector.load %arg11[%c0_46, %c0_47] : memref<16x1xf32, #tpu.memory_space<vmem>>, vector<16x1xf32>
      %69 = arith.mulf %66, %68 : vector<16x1xf32>
      %70 = arith.subf %67, %69 : vector<16x1xf32>
      %c0_48 = arith.constant 0 : index
      %c0_49 = arith.constant 0 : index
      %71 = vector.load %arg9[%c0_48, %c0_49] : memref<16x1xf32, #tpu.memory_space<vmem>>, vector<16x1xf32>
      %72 = arith.divf %70, %71 : vector<16x1xf32>
      %73 = tpu.iota {dimensions = array<i32: 0>} : vector<16x1xi32>
      %c16_i32 = arith.constant 16 : i32
      %74 = arith.muli %arg0, %c16_i32 : i32
      %75 = vector.broadcast %74 : i32 to vector<16x1xi32>
      %76 = arith.addi %73, %75 : vector<16x1xi32>
      %c0_50 = arith.constant 0 : index
      %c0_51 = arith.constant 0 : index
      %77 = vector.load %arg4[%c0_50, %c0_51] : memref<16x1xi32, #tpu.memory_space<vmem>>, vector<16x1xi32>
      %c-100_i32 = arith.constant -100 : i32
      %78 = vector.broadcast %c-100_i32 : i32 to vector<16x1xi32>
      %79 = arith.cmpi ne, %77, %78 : vector<16x1xi32>
      %c16_i32_52 = arith.constant 16 : i32
      %80 = vector.broadcast %c16_i32_52 : i32 to vector<16x1xi32>
      %81 = arith.cmpi slt, %76, %80 : vector<16x1xi32>
      %82 = arith.andi %79, %81 : vector<16x1xi1>
      %83 = vector.broadcast %cst_40 : f32 to vector<16x1xf32>
      %84 = arith.select %82, %72, %83 : vector<16x1xi1>, vector<16x1xf32>
      %85 = vector.shape_cast %84 : vector<16x1xf32> to vector<1x16x1xf32>
      %cst_53 = arith.constant dense<0.000000e+00> : vector<1xf32>
      %86 = vector.multi_reduction <add>, %85, %cst_53 [1, 2] : vector<1x16x1xf32> to vector<1xf32>
      %87 = vector.shape_cast %86 : vector<1xf32> to vector<1x1x1xf32>
      %88 = vector.extract %87[0, 0, 0] : f32 from vector<1x1x1xf32>
      %89 = arith.extui %82 : vector<16x1xi1> to vector<16x1xi32>
      %90 = arith.sitofp %89 : vector<16x1xi32> to vector<16x1xf32>
      %91 = vector.shape_cast %90 : vector<16x1xf32> to vector<1x16x1xf32>
      %cst_54 = arith.constant dense<0.000000e+00> : vector<1xf32>
      %92 = vector.multi_reduction <add>, %91, %cst_54 [1, 2] : vector<1x16x1xf32> to vector<1xf32>
      %93 = vector.shape_cast %92 : vector<1xf32> to vector<1x1x1xf32>
      %94 = vector.extract %93[0, 0, 0] : f32 from vector<1x1x1xf32>
      %95 = tpu.iota {dimensions = array<i32: 2>} : vector<1x1x128xi32>
      %c0_i32_55 = arith.constant 0 : i32
      %96 = vector.broadcast %c0_i32_55 : i32 to vector<1x1x128xi32>
      %97 = arith.cmpi eq, %95, %96 : vector<1x1x128xi32>
      %c1_i32 = arith.constant 1 : i32
      %98 = vector.broadcast %c1_i32 : i32 to vector<1x1x128xi32>
      %99 = arith.cmpi eq, %95, %98 : vector<1x1x128xi32>
      %100 = vector.broadcast %94 : f32 to vector<1x1x128xf32>
      %101 = vector.broadcast %cst_40 : f32 to vector<1x1x128xf32>
      %102 = arith.select %99, %100, %101 : vector<1x1x128xi1>, vector<1x1x128xf32>
      %103 = vector.broadcast %88 : f32 to vector<1x1x128xf32>
      %104 = arith.select %97, %103, %102 : vector<1x1x128xi1>, vector<1x1x128xf32>
      %c0_56 = arith.constant 0 : index
      %c0_57 = arith.constant 0 : index
      %c0_58 = arith.constant 0 : index
      %105 = vector.load %arg5[%c0_56, %c0_57, %c0_58] : memref<1x1x128xf32, #tpu.memory_space<vmem>>, vector<1x1x128xf32>
      tpu.vector_store %arg5[%c0_56, %c0_57, %c0_58], %104 {strides = array<i32>} : memref<1x1x128xf32, #tpu.memory_space<vmem>>, vector<1x1x128xf32>,
    } else {
    }
    return
  }
  func.func @transform_0(%arg0: i32, %arg1: i32) -> (i32, i32) {
    %c0_i32 = arith.constant 0 : i32
    return %arg0, %arg1 : i32, i32
  }
  func.func @transform_1(%arg0: i32, %arg1: i32) -> (i32, i32) {
    %c0_i32 = arith.constant 0 : i32
    return %arg0, %arg1 : i32, i32
  }
  func.func @transform_2(%arg0: i32, %arg1: i32) -> (i32, i32) {
    %c0_i32 = arith.constant 0 : i32
    %c0_i32_0 = arith.constant 0 : i32
    return %arg0, %c0_i32 : i32, i32
  }
  func.func @transform_3(%arg0: i32, %arg1: i32) -> (i32, i32, i32) {
    %c0_i32 = arith.constant 0 : i32
    %c0_i32_0 = arith.constant 0 : i32
    %c0_i32_1 = arith.constant 0 : i32
    return %arg0, %c0_i32, %c0_i32_0 : i32, i32, i32
  }
}

</mosaic_0001>

<bundles_post_ra>
// kernel: tpu_custom_call.1
= control target key start
LH: loop header
LB: loop body
LE: loop exit
PB: predicated region body
PF: predicated region fallthrough
CT: control target
= control target key end

     0   :  { %8 = vsyncpa [#allocation9], 0  ;;  %s627_s0 = inlined_call_operand.hbm [shape: f32[16,256], index: 0, kind: input, shape index: {}]   ;;  %s628_s1 = inlined_call_operand.hbm [shape: f32[16,256], index: 1, kind: input, shape index: {}]   ;;  %s629_s2 = inlined_call_operand.vmem [shape: s32[16,1], index: 2, kind: input, shape index: {}]   ;;  %s630_s3 = inlined_call_operand.hbm [shape: f32[1,1,128], index: 3, kind: output, shape index: {}]  }
   0x1   :  { %9 = vsyncpa [#allocation12], 0 }
   0x2   :  { %10 = vsyncpa [#allocation10], 0  ;;  %s443_s12 = smov [#allocation8]  }
   0x3   :  { %s16_s13 = sshll.u32 %s443_s12, 4  ;;  %s17_s13 = int_to_ptr.vmem [resolvable:$true] %s16_s13 }
   0x4   :  { %s385_s14 = scalar_lea.vmem %s17_s13, 512  ;;  %p390_p1 = scmp.lt.s32.totalorder %s17_s13, %s17_s13 }
   0x5   :  { %p386_p0 = scmp.ne.s32.totalorder %s17_s13, %s385_s14  ;;  %p391_p2 = scmp.lt.s32.totalorder %s385_s14, %s385_s14 }
   0x7   :  { %p392_p3 = por %p391_p2, %p390_p1 }
   0x9   :  { %p393_p4 = pnand %p392_p3, %p386_p0 }
   0xb   :  { %396 = shalt.err (!%p393_p4)
}
   0xc   :  { %s444_s15 = smov 256   ;;  %s445_s16 = smov 16  }
   0xd   :  { %22 = dma.hbm_to_vmem [thread:$0]  %s627_s0, 512, %s17_s13, [#allocation9], %s444_s15, %s444_s15, %s445_s16  }
   0xe   :  { %s446_s19 = smov [#allocation11]  }
   0xf   :  { %s28_s20 = sshll.u32 %s446_s19, 4  ;;  %s29_s20 = int_to_ptr.vmem [resolvable:$true] %s28_s20 }
  0x10   :  { %s405_s21 = scalar_lea.vmem %s29_s20, 512  ;;  %p410_p6 = scmp.lt.s32.totalorder %s29_s20, %s29_s20 }
  0x11   :  { %p406_p5 = scmp.ne.s32.totalorder %s29_s20, %s405_s21  ;;  %p411_p7 = scmp.lt.s32.totalorder %s405_s21, %s405_s21 }
  0x13   :  { %p412_p8 = por %p411_p7, %p410_p6 }
  0x15   :  { %p413_p9 = pnand %p412_p8, %p406_p5 }
  0x17   :  { %416 = shalt.err (!%p413_p9)
}
  0x18   :  { %34 = dma.hbm_to_vmem [thread:$0]  %s628_s1, 512, %s29_s20, [#allocation12], %s444_s15, %s444_s15, %s445_s16  }
  0x19   :  { %437 = dma.done.wait [#allocation9], 512  }
  0x1a   :  { %438 = vsyncadd [#allocation9], 4294966784 }
  0x1b   :  { %439 = dma.done.wait [#allocation12], 512  }
  0x1c   :  { %440 = vsyncadd [#allocation12], 4294966784  ;;  %vm47_vm0 = vcmask 7168   ;;  %v447_v0 = vmov -1e+30   ;;  %v482_v1 = vld [vmem:[#allocation11] sm:$0xff] }
  0x1d   :  { %50 = vst.msk [vmem:[#allocation4] sm:$0xff] %vm47_vm0, %v447_v0  ;;  %48 = vst.msk [vmem:[#allocation2] sm:$0xff] %vm47_vm0, %v447_v0  ;;  %v484_v2 = vld [vmem:[#allocation11 + $0x8] sm:$0xff]  ;;  %v486_v3 = vld [vmem:[#allocation8] sm:$0xff]  ;;  %v448_v13 = vmov 0.0   ;;  %v449_v14 = vmov 0  }
  0x1e   :  { %49 = vst.msk [vmem:[#allocation2 + $0x8] sm:$0xff] %vm47_vm0, %v447_v0  ;;  %51 = vst.msk [vmem:[#allocation4 + $0x8] sm:$0xff] %vm47_vm0, %v447_v0  ;;  %v82_v4 = vmax.f32 %v482_v1, %v484_v2  ;;  %v490_v5 = vld [vmem:[#allocation8 + $0x8] sm:$0xff]  ;;  %v492_v6 = vld [vmem:[#allocation11 + $0x10] sm:$0xff]  ;;  %343 = vset.pattern.permute.xlu0 %v449_v14  ;;  %344 = vset.pattern.permute.xlu1 %v449_v14  ;;  %vm450_vm3 = vmmov 1   ;;  %s451_s26 = smov [#allocation13]  }
  0x1f   :  { %v494_v7 = vld [vmem:[#allocation11 + $0x18] sm:$0xff]  ;;  %v120_v8 = vmax.f32 %v486_v3, %v490_v5  ;;  %v498_v9 = vld [vmem:[#allocation8 + $0x10] sm:$0xff]  ;;  %52 = vst.msk [vmem:[#allocation3] sm:$0xff] %vm47_vm0, %v448_v13  ;;  %53 = vst.msk [vmem:[#allocation3 + $0x8] sm:$0xff] %vm47_vm0, %v448_v13  ;;  %s318_s27 = sshll.u32 %s451_s26, 4  ;;  %s319_s27 = int_to_ptr.vmem [resolvable:$true] %s318_s27 }
  0x20   :  { %v500_v10 = vld [vmem:[#allocation8 + $0x18] sm:$0xff]  ;;  %83 = vmax.xlane.f32.xlu1 %v82_v4  ;;  %v85_v11 = vmax.f32 %v492_v6, %v494_v7  ;;  %54 = vst.msk [vmem:[#allocation5] sm:$0xff] %vm47_vm0, %v448_v13  ;;  %55 = vst.msk [vmem:[#allocation5 + $0x8] sm:$0xff] %vm47_vm0, %v448_v13  ;;  %s417_s29 = scalar_lea.vmem %s319_s27, 16  ;;  %s421_s30 = scalar_lea.vmem %s319_s27, 32 }
  0x21   :  { %121 = vmax.xlane.f32.xlu0 %v120_v8  ;;  %v123_v12 = vmax.f32 %v498_v9, %v500_v10  ;;  %56 = vst.msk [vmem:[#allocation6] sm:$0xff] %vm47_vm0, %v448_v13  ;;  %57 = vst.msk [vmem:[#allocation6 + $0x8] sm:$0xff] %vm47_vm0, %v448_v13  ;;  %p418_p10 = scmp.ne.s32.totalorder %s319_s27, %s417_s29  ;;  %p422_p11 = scmp.lt.s32.totalorder %s319_s27, %s319_s27 }
  0x22   :  { %58 = vst.msk [vmem:[#allocation7] sm:$0xff] %vm47_vm0, %v448_v13  ;;  %59 = vst.msk [vmem:[#allocation7 + $0x8] sm:$0xff] %vm47_vm0, %v448_v13  ;;  %p423_p12 = scmp.lt.s32.totalorder %s421_s30, %s417_s29 }
  0x24   :  { %86 = vmax.xlane.f32.xlu1 %v85_v11  ;;  %v80_v15 = vld [vmem:[#allocation4] sm:$0xff]  ;;  %p424_p13 = por %p423_p12, %p422_p11 }
  0x25   :  { %124 = vmax.xlane.f32.xlu0 %v123_v12  ;;  %v118_v16 = vld [vmem:[#allocation2] sm:$0xff]  ;;  %v81_v21 = vld [vmem:[#allocation4 + $0x8] sm:$0xff]  ;;  %v65_v12 = vand.u32 2147483647, %v490_v5 }
  0x26   :  { %v119_v23 = vld [vmem:[#allocation2 + $0x8] sm:$0xff]  ;;  %p425_p0 = pnand %p424_p13, %p418_p10 }
  0x27   :  { %vm69_vm2 = vcmp.eq.f32.partialorder %v65_v12, inf }
  0x28   :  { %v209_v35 = vld [vmem:[#allocation6] sm:$0xff]  ;;  %v210_v41 = vld [vmem:[#allocation6 + $0x8] sm:$0xff]  ;;  %vm566_vm5 = vmxor %vm69_vm2, %vm450_vm3 }
  0x29   :  { %v530_v33 = vld [vmem:[#allocation7] sm:$0xff]  ;;  %v534_v36 = vld [vmem:[#allocation7 + $0x8] sm:$0xff] }
  0xa9   :  { %v84_v17 = vpop.xlane.xlu1 %83 }
  0xaa   :  { %v88_v18 = vmax.f32 %v80_v15, %v84_v17  ;;  %v122_v19 = vpop.xlane.xlu0 %121 }
  0xab   :  { %v126_v20 = vmax.f32 %v118_v16, %v122_v19 }
  0xac   :  { %v90_v22 = vsub.f32 %v80_v15, %v88_v18  ;;  %233 = vst.msk [vmem:[#allocation4] sm:$0xff] %vm47_vm0, %v88_v18 }
  0xad   :  { %v523_v24 = vsub.f32 %v118_v16, %v126_v20  ;;  %231 = vst.msk [vmem:[#allocation2] sm:$0xff] %vm47_vm0, %v126_v20  ;;  %136 = vperm.xlu0 %343, %v126_v20   ;;  %v87_v25 = vpop.xlane.xlu1 %86 }
  0xae   :  { %v92_v26 = vmul.f32 1.442695, %v90_v22  ;;  %v89_v27 = vmax.f32 %v81_v21, %v87_v25  ;;  %v125_v28 = vpop.xlane.xlu0 %124 }
  0xaf   :  { %v127_v29 = vmax.f32 %v119_v23, %v125_v28  ;;  %v213_v34 = vmul.f32 %v530_v33, %v523_v24 }
  0xb0   :  { %345 = vpow2.f32 %v92_v26  ;;  %v91_v30 = vsub.f32 %v81_v21, %v89_v27  ;;  %234 = vst.msk [vmem:[#allocation4 + $0x8] sm:$0xff] %vm47_vm0, %v89_v27 }
  0xb1   :  { %v527_v31 = vsub.f32 %v119_v23, %v127_v29  ;;  %232 = vst.msk [vmem:[#allocation2 + $0x8] sm:$0xff] %vm47_vm0, %v127_v29  ;;  %141 = vperm.xlu1 %344, %v127_v29   ;;  %v215_v37 = vadd.f32 %v213_v34, %v209_v35 }
  0xb2   :  { %v94_v32 = vmul.f32 1.442695, %v91_v30 }
  0xb3   :  { %v214_v39 = vmul.f32 %v534_v36, %v527_v31 }
  0xb4   :  { %347 = vpow2.f32 %v94_v32 }
  0xb5   :  { %98 = vperm.xlu1 %344, %v88_v18   ;;  %v216_v43 = vadd.f32 %v214_v39, %v210_v41  ;;  %v67_v18 = vand.u32 2147483647, %v500_v10 }
  0xb7   :  { %vm71_vm7 = vcmp.eq.f32.partialorder %v67_v18, inf }
  0xb8   :  { %vm75_vm9 = vmxor %vm71_vm7, %vm450_vm3 }
  0xb9   :  { %103 = vperm.xlu1 %344, %v89_v27  }
  0xbd   :  { %v536_v38 = vpop.eup %345 }
  0xbe   :  { %v541_v40 = vmul.f32 %v536_v38, %v215_v37 }
  0xc1   :  { %v543_v42 = vpop.eup %347 }
  0xc2   :  { %v546_v44 = vmul.f32 %v543_v42, %v216_v43  ;;  %v583_v43 = vld [vmem:[%s629_s2] sm:$0xff] }
  0xc3   :  { %vm267_vm10 = vcmp.ne.s32.totalorder %v583_v43, 4294967196 }
 0x128   :  { %v137_v45 = vpop.permute.xlu0 %136 }
 0x129   :  { %v144_v46 = vsub.f32 %v486_v3, %v137_v45  ;;  %v145_v47 = vsub.f32 %v490_v5, %v137_v45  ;;  %v588_v45 = vld [vmem:[%s629_s2 + $0x8] sm:$0xff] }
 0x12a   :  { %vm268_vm11 = vcmp.ne.s32.totalorder %v588_v45, 4294967196 }
 0x12b   :  { %v152_v48 = vmul.f32 1.442695, %v144_v46  ;;  %v154_v49 = vmul.f32 1.442695, %v145_v47 }
 0x12c   :  { %v142_v50 = vpop.permute.xlu1 %141 }
 0x12d   :  { %349 = vpow2.f32 %v152_v48  ;;  %v146_v51 = vsub.f32 %v498_v9, %v142_v50  ;;  %v147_v52 = vsub.f32 %v500_v10, %v142_v50 }
 0x12e   :  { %351 = vpow2.f32 %v154_v49 }
 0x12f   :  { %v156_v53 = vmul.f32 1.442695, %v146_v51  ;;  %v158_v54 = vmul.f32 1.442695, %v147_v52 }
 0x130   :  { %v99_v55 = vpop.permute.xlu1 %98 }
 0x131   :  { %353 = vpow2.f32 %v156_v53  ;;  %v106_v56 = vsub.f32 %v482_v1, %v99_v55  ;;  %v107_v57 = vsub.f32 %v484_v2, %v99_v55  ;;  %v64_v1 = vand.u32 2147483647, %v486_v3 }
 0x132   :  { %355 = vpow2.f32 %v158_v54  ;;  %v148_v54 = vld [vmem:[#allocation3] sm:$0xff] }
 0x133   :  { %v110_v58 = vmul.f32 1.442695, %v106_v56  ;;  %v112_v59 = vmul.f32 1.442695, %v107_v57  ;;  %vm68_vm1 = vcmp.eq.f32.partialorder %v64_v1, inf }
 0x134   :  { %v104_v60 = vpop.permute.xlu1 %103  ;;  %vm561_vm4 = vmxor %vm68_vm1, %vm450_vm3 }
 0x135   :  { %357 = vpow2.f32 %v110_v58  ;;  %v108_v61 = vsub.f32 %v492_v6, %v104_v60  ;;  %v109_v62 = vsub.f32 %v494_v7, %v104_v60  ;;  %v66_v7 = vand.u32 2147483647, %v498_v9  ;;  %v149_v58 = vld [vmem:[#allocation3 + $0x8] sm:$0xff] }
 0x136   :  { %359 = vpow2.f32 %v112_v59 }
 0x137   :  { %v114_v63 = vmul.f32 1.442695, %v108_v61  ;;  %v116_v0 = vmul.f32 1.442695, %v109_v62  ;;  %vm70_vm6 = vcmp.eq.f32.partialorder %v66_v7, inf  ;;  %v171_v61 = vld [vmem:[#allocation5] sm:$0xff] }
 0x138   :  { %vm74_vm8 = vmxor %vm70_vm6, %vm450_vm3 }
 0x139   :  { %361 = vpow2.f32 %v114_v63 }
 0x13a   :  { %v350_v4 = vpop.eup %349  ;;  %363 = vpow2.f32 %v116_v0 }
 0x13b   :  { %v352_v8 = vpop.eup %351 }
 0x13c   :  { %v160_v11 = vadd.f32 %v352_v8, %v350_v4 }
 0x13e   :  { %v354_v2 = vpop.eup %353  ;;  %161 = vadd.xlane.f32.xlu1 %v160_v11 }
 0x13f   :  { %v356_v14 = vpop.eup %355 }
 0x140   :  { %v163_v15 = vadd.f32 %v356_v14, %v354_v2 }
 0x142   :  { %v358_v6 = vpop.eup %357  ;;  %164 = vadd.xlane.f32.xlu0 %v163_v15  ;;  %v225_v15 = vmul.f32 %v536_v38, %v530_v33 }
 0x143   :  { %v360_v16 = vpop.eup %359  ;;  %v185_v17 = vmul.f32 %v358_v6, %v144_v46  ;;  %v199_v26 = vsel %vm561_vm4, %v358_v6, 0.0  ;;  %v328_v46 = vsel %vm267_vm10, 1.0, %v448_v13 }
 0x144   :  { %v175_v19 = vadd.f32 %v360_v16, %v358_v6  ;;  %v186_v5 = vmul.f32 %v360_v16, %v145_v47  ;;  %v200_v27 = vsel %vm566_vm5, %v360_v16, 0.0  ;;  %v329_v47 = vsel %vm268_vm11, 1.0, %v448_v13 }
 0x145   :  { %v189_v9 = vsel %vm561_vm4, %v185_v17, 0.0  ;;  %v203_v28 = vadd.f32 %v200_v27, %v199_v26  ;;  %v291_v48 = vsel %vm47_vm0, %v328_v46, 0.0  ;;  %v292_v49 = vsel %vm47_vm0, %v329_v47, 0.0 }
 0x146   :  { %v362_v21 = vpop.eup %361  ;;  %176 = vadd.xlane.f32.xlu1 %v175_v19  ;;  %v190_v10 = vsel %vm566_vm5, %v186_v5, 0.0  ;;  %v293_v50 = vadd.f32 %v292_v49, %v291_v48  ;;  %v226_v17 = vmul.f32 %v543_v42, %v534_v36 }
 0x147   :  { %v364_v22 = vpop.eup %363  ;;  %v193_v23 = vadd.f32 %v190_v10, %v189_v9  ;;  %v201_v29 = vsel %vm74_vm8, %v362_v21, 0.0  ;;  %v187_v32 = vmul.f32 %v362_v21, %v146_v51  ;;  %v130_v51 = vmul.f32 1.442695, %v523_v24 }
 0x148   :  { %v178_v25 = vadd.f32 %v364_v22, %v362_v21  ;;  %v202_v30 = vsel %vm75_vm9, %v364_v22, 0.0  ;;  %v188_v34 = vmul.f32 %v364_v22, %v147_v52  ;;  %v132_v52 = vmul.f32 1.442695, %v527_v31  ;;  %v172_v31 = vld [vmem:[#allocation5 + $0x8] sm:$0xff] }
 0x149   :  { %194 = vadd.xlane.f32.xlu0 %v193_v23  ;;  %v206_v35 = vadd.f32 %v202_v30, %v201_v29  ;;  %v191_v37 = vsel %vm74_vm8, %v187_v32, 0.0  ;;  %365 = vpow2.f32 %v130_v51  ;;  %v173_v24 = vmul.f32 %v536_v38, %v171_v61 }
 0x14a   :  { %179 = vadd.xlane.f32.xlu1 %v178_v25  ;;  %v192_v39 = vsel %vm75_vm9, %v188_v34, 0.0  ;;  %367 = vpow2.f32 %v132_v52  ;;  %v174_v11 = vmul.f32 %v543_v42, %v172_v31 }
 0x14b   :  { %v196_v41 = vadd.f32 %v192_v39, %v191_v37 }
 0x14e   :  { %204 = vadd.xlane.f32.xlu1 %v203_v28 }
 0x152   :  { %207 = vadd.xlane.f32.xlu1 %v206_v35 }
 0x156   :  { %197 = vadd.xlane.f32.xlu1 %v196_v41  ;;  %v366_v53 = vpop.eup %365 }
 0x157   :  { %v150_v55 = vmul.f32 %v366_v53, %v148_v54  ;;  %v368_v56 = vpop.eup %367 }
 0x158   :  { %v151_v13 = vmul.f32 %v368_v56, %v149_v58  ;;  %v303_v56 = vlaneseq }
 0x15a   :  { %294 = vadd.xlane.f32.xlu1 %v293_v50 }
 0x1c7   :  { %v162_v57 = vpop.xlane.xlu1 %161 }
 0x1c8   :  { %v166_v59 = vadd.f32 %v162_v57, %v150_v55  ;;  %v304_v57 = vand.u32 127, %v303_v56 }
 0x1ca   :  { %169 = vst.msk [vmem:[#allocation3] sm:$0xff] %vm47_vm0, %v166_v59  ;;  %vm306_vm12 = vcmp.eq.s32.totalorder %v304_v57, 1  ;;  %vm305_vm13 = vcmp.eq.s32.totalorder %v304_v57, 0 }
 0x1cb   :  { %v165_v60 = vpop.xlane.xlu0 %164 }
 0x1cc   :  { %v167_v62 = vadd.f32 %v165_v60, %v151_v13 }
 0x1ce   :  { %170 = vst.msk [vmem:[#allocation3 + $0x8] sm:$0xff] %vm47_vm0, %v167_v62 }
 0x1cf   :  { %v177_v63 = vpop.xlane.xlu1 %176 }
 0x1d0   :  { %v181_v0 = vadd.f32 %v177_v63, %v173_v24 }
 0x1d1   :  { %v238_v4 = vld [vmem:[#allocation3] sm:$0xff] }
 0x1d2   :  { %183 = vst.msk [vmem:[#allocation5] sm:$0xff] %vm47_vm0, %v181_v0  ;;  %v195_v8 = vpop.xlane.xlu0 %194  ;;  %369 = vlog2.f32 %v238_v4 }
 0x1d3   :  { %v219_v1 = vadd.f32 %v541_v40, %v195_v8  ;;  %v180_v2 = vpop.xlane.xlu1 %179 }
 0x1d4   :  { %v182_v12 = vadd.f32 %v180_v2, %v174_v11 }
 0x1d5   :  { %221 = vst.msk [vmem:[#allocation6] sm:$0xff] %vm47_vm0, %v219_v1  ;;  %v239_v14 = vld [vmem:[#allocation3 + $0x8] sm:$0xff] }
 0x1d6   :  { %184 = vst.msk [vmem:[#allocation5 + $0x8] sm:$0xff] %vm47_vm0, %v182_v12  ;;  %371 = vlog2.f32 %v239_v14 }
 0x1d7   :  { %v205_v6 = vpop.xlane.xlu1 %204 }
 0x1d8   :  { %v227_v7 = vadd.f32 %v225_v15, %v205_v6 }
 0x1d9   :  { %v252_v16 = vld [vmem:[#allocation5] sm:$0xff] }
 0x1da   :  { %229 = vst.msk [vmem:[#allocation7] sm:$0xff] %vm47_vm0, %v227_v7  ;;  %373 = vrcp.f32 %v252_v16 }
 0x1db   :  { %v208_v40 = vpop.xlane.xlu1 %207 }
 0x1dc   :  { %v228_v18 = vadd.f32 %v226_v17, %v208_v40  ;;  %v244_v22 = vld [vmem:[#allocation6] sm:$0xff] }
 0x1dd   :  { %v253_v19 = vld [vmem:[#allocation5 + $0x8] sm:$0xff] }
 0x1de   :  { %230 = vst.msk [vmem:[#allocation7 + $0x8] sm:$0xff] %vm47_vm0, %v228_v18  ;;  %375 = vrcp.f32 %v253_v19 }
 0x1df   :  { %v370_v3 = vpop.eup %369  ;;  %v198_v5 = vpop.xlane.xlu1 %197 }
 0x1e0   :  { %v220_v33 = vadd.f32 %v546_v44, %v198_v5  ;;  %v241_v38 = vmul.f32 0.6931472, %v370_v3 }
 0x1e1   :  { %v246_v20 = vld [vmem:[#allocation7] sm:$0xff] }
 0x1e2   :  { %222 = vst.msk [vmem:[#allocation6 + $0x8] sm:$0xff] %vm47_vm0, %v220_v33  ;;  %v248_v9 = vmul.f32 %v246_v20, %v241_v38 }
 0x1e3   :  { %v372_v21 = vpop.eup %371  ;;  %v295_v39 = vpop.xlane.xlu1 %294 }
 0x1e4   :  { %v243_v10 = vmul.f32 0.6931472, %v372_v21  ;;  %v250_v42 = vsub.f32 %v244_v22, %v248_v9  ;;  %v296_v41 = vrot.slane %v295_v39, 4 }
 0x1e5   :  { %v247_v36 = vld [vmem:[#allocation7 + $0x8] sm:$0xff] }
 0x1e6   :  { %v249_v25 = vmul.f32 %v247_v36, %v243_v10  ;;  %v297_v46 = vadd.f32 %v296_v41, %v295_v39 }
 0x1e7   :  { %v374_v23 = vpop.eup %373 }
 0x1e8   :  { %v255_v26 = vmul.f32 %v374_v23, %v250_v42  ;;  %v298_v47 = vrot.slane %v297_v46, 2 }
 0x1e9   :  { %v245_v27 = vld [vmem:[#allocation6 + $0x8] sm:$0xff] }
 0x1ea   :  { %v251_v28 = vsub.f32 %v245_v27, %v249_v25  ;;  %v273_v44 = vsel %vm267_vm10, %v255_v26, 0.0  ;;  %v299_v51 = vadd.f32 %v298_v47, %v297_v46 }
 0x1eb   :  { %v376_v29 = vpop.eup %375  ;;  %v275_v34 = vsel %vm47_vm0, %v273_v44, 0.0 }
 0x1ec   :  { %v257_v30 = vmul.f32 %v376_v29, %v251_v28  ;;  %v300_v53 = vrot.slane %v299_v51, 1 }
 0x1ee   :  { %v274_v32 = vsel %vm268_vm11, %v257_v30, 0.0  ;;  %v301_v55 = vadd.f32 %v300_v53, %v299_v51 }
 0x1ef   :  { %v276_v35 = vsel %vm47_vm0, %v274_v32, 0.0 }
 0x1f0   :  { %v277_v37 = vadd.f32 %v276_v35, %v275_v34 }
 0x1f2   :  { %278 = vadd.xlane.f32.xlu0 %v277_v37 }
 0x27b   :  { %v279_v48 = vpop.xlane.xlu0 %278 }
 0x27c   :  { %v280_v49 = vrot.slane %v279_v48, 4 }
 0x27e   :  { %v281_v50 = vadd.f32 %v280_v49, %v279_v48 }
 0x280   :  { %v282_v52 = vrot.slane %v281_v50, 2 }
 0x282   :  { %v283_v43 = vadd.f32 %v282_v52, %v281_v50 }
 0x284   :  { %v284_v54 = vrot.slane %v283_v43, 1 }
 0x286   :  { %v285_v45 = vadd.f32 %v284_v54, %v283_v43 }
 0x288   :  { %330 = vpush %v285_v45 }
 0x289   :  { %332 = vpush %v301_v55 }
 0x2b9   :  { %s331_s2 = spop %330 }
 0x2ba   :  { %v309_v58 = vstv %s331_s2  ;;  %s333_s28 = spop %332 }
 0x2bb   :  { %v307_v59 = vstv %s333_s28 }
 0x2bc   :  { %v308_v13 = vsel %vm306_vm12, %v307_v59, 0.0 }
 0x2bd   :  { %v310_v60 = vsel %vm305_vm13, %v309_v58, %v308_v13 }
 0x2be   :  { %311 = vst [vmem:[#allocation13] sm:$0x1] %v310_v60 }
 0x2bf   :  { %428 = shalt.err (!%p425_p0)
}
 0x2c0   :  { %321 = dma.vmem_to_hbm [thread:$0]  %s319_s27, 16, %s630_s3, [#allocation10]  }
 0x2c1   :  { %441 = dma.done.wait [#allocation10], 16  }
 0x2c2   :  { %442 = vsyncadd [#allocation10], 4294967280 }
 0x2c3   :  { %325 = vsyncpa [#allocation9], 1 }
 0x2c4   :  { %326 = vsyncpa [#allocation12], 1 }
 0x2c5   :  { %327 = vsyncpa [#allocation10], 1 }

</bundles_post_ra>
